<compile_context>
chip_gen: v5e
topology: v5e:2x2
jax: 0.10.0
libtpu: 0.0.40
codegen_flags: <defaults>
</compile_context>

<pallas_src>
import jax
import jax.numpy as jnp
from jax.experimental import pallas as pl
from jax.experimental.pallas import tpu as pltpu

_INV_SQRT2 = 0.7071067811865476


def _erf_f32(x):
    # Abramowitz & Stegun 7.1.26; |error| <= 1.5e-7 (f32-exact for GELU).
    p = 0.3275911
    a1, a2, a3, a4, a5 = (0.254829592, -0.284496736, 1.421413741,
                          -1.453152027, 1.061405429)
    ax = jnp.abs(x)
    t = 1.0 / (1.0 + p * ax)
    poly = t * (a1 + t * (a2 + t * (a3 + t * (a4 + t * a5))))
    y = 1.0 - poly * jnp.exp(-ax * ax)
    return jnp.where(x < 0.0, -y, y)


def _gelu_exact(x):
    # Matches PyTorch nn.GELU() default (approximate='none'): x * Phi(x).
    return 0.5 * x * (1.0 + _erf_f32(x * _INV_SQRT2))


def _mlp_kernel(x_ref, w1_ref, b1_ref, w2_ref, b2_ref, o_ref, acc_ref):
    # x_ref: (tm, E)   w1_ref: (E, td)   b1_ref: (1, td)
    # w2_ref: (td, E)  b2_ref: (1, E)    o_ref: (tm, E)   acc_ref: (tm, E) f32
    j = pl.program_id(1)

    @pl.when(j == 0)
    def _init():
        acc_ref[...] = jnp.zeros_like(acc_ref)

    x = x_ref[...].astype(jnp.float32)
    h = jnp.dot(x, w1_ref[...].astype(jnp.float32),
                preferred_element_type=jnp.float32,
                precision=jax.lax.Precision.HIGHEST)
    h = _gelu_exact(h + b1_ref[...].astype(jnp.float32))
    acc_ref[...] += jnp.dot(h, w2_ref[...].astype(jnp.float32),
                            preferred_element_type=jnp.float32,
                            precision=jax.lax.Precision.HIGHEST)

    @pl.when(j == pl.num_programs(1) - 1)
    def _finalize():
        o_ref[...] = (acc_ref[...]
                      + b2_ref[...].astype(jnp.float32)).astype(o_ref.dtype)


def _round_up(n, m):
    return (n + m - 1) // m * m


_VMEM_LIMIT = 48 * 1024 * 1024   # < 64 MiB physical on v7x; safe on v5e/v6e
_TILE_BUDGET = 24 * 1024 * 1024  # per-step pipeline tiles + accumulator


def _step_bytes(tm, E, td, itemsize):
    # Double-buffered pipeline tiles (x, w1, b1, w2, b2, out) + f32 accumulator.
    dbl = 2 * itemsize * (tm * E + E * td + td + td * E + E + tm * E)
    return dbl + 4 * tm * E


def _choose_td(D, E, tm, itemsize):
    d128 = _round_up(D, 128)
    # Single reduction step if everything fits: weights stay resident (block
    # index constant over the grid), fetched once per kernel.
    if d128 == 128 or _step_bytes(tm, E, d128, itemsize) <= _TILE_BUDGET:
        return d128
    # Otherwise, largest 128-multiple divisor of d128 within budget (no waste).
    cand = (d128 // 128) * 128
    while cand >= 128:
        if d128 % cand == 0 and _step_bytes(tm, E, cand, itemsize) <= _TILE_BUDGET:
            return cand
        cand -= 128
    # Fallback: largest 128-multiple within budget, pad the hidden dim.
    cand = d128
    while cand > 128 and _step_bytes(tm, E, cand, itemsize) > _TILE_BUDGET:
        cand -= 128
    return max(cand, 128)


def mlp_block(x, w1, b1, w2, b2, *, tm=None, td=None):
    """MLPBlock forward.  x: (..., E); w1: (E, D); b1: (D,); w2: (D, E); b2: (E,)."""
    orig_shape = x.shape
    E = x.shape[-1]
    D = w1.shape[1]
    x2 = x.reshape(-1, E)
    M = x2.shape[0]
    itemsize = max(jnp.dtype(x.dtype).itemsize, jnp.dtype(w1.dtype).itemsize)

    # Row tile: multiple of 8 sublanes, capped so tiles stay cheap to pipeline.
    if tm is None:
        tm = min(256, _round_up(M, 8))
    m_pad = _round_up(M, tm)
    if m_pad != M:
        x2 = jnp.pad(x2, ((0, m_pad - M), (0, 0)))

    # Hidden (mlp_dim) tile: innermost "arbitrary" reduction axis.
    if td is None:
        td = _choose_td(D, E, tm, itemsize)
    d_pad = _round_up(D, td)
    if d_pad != D:
        # Zero-padding the hidden dim is exact: padded columns give gelu(0)=0
        # and multiply zero rows of w2.
        w1 = jnp.pad(w1, ((0, 0), (0, d_pad - D)))
        b1 = jnp.pad(b1, ((0, d_pad - D),))
        w2 = jnp.pad(w2, ((0, d_pad - D), (0, 0)))
    nd = d_pad // td

    b1_2 = b1.reshape(1, -1)
    b2_2 = b2.reshape(1, E)

    flops = 2 * 2 * m_pad * d_pad * E + 10 * m_pad * d_pad      # 2 matmuls + gelu
    bytes_accessed = itemsize * (2 * m_pad * E + 2 * E * d_pad + d_pad + E)
    cost = pl.CostEstimate(flops=flops, transcendentals=m_pad * d_pad,
                           bytes_accessed=bytes_accessed)

    out = pl.pallas_call(
        _mlp_kernel,
        out_shape=jax.ShapeDtypeStruct((m_pad, E), x.dtype),
        grid_spec=pltpu.PrefetchScalarGridSpec(
            num_scalar_prefetch=0,
            grid=(m_pad // tm, nd),
            in_specs=[
                pl.BlockSpec((tm, E), lambda i, j: (i, 0)),   # x rows (resident over j)
                pl.BlockSpec((E, td), lambda i, j: (0, j)),   # w1 hidden slice
                pl.BlockSpec((1, td), lambda i, j: (0, j)),   # b1 hidden slice
                pl.BlockSpec((td, E), lambda i, j: (j, 0)),   # w2 hidden slice
                pl.BlockSpec((1, E), lambda i, j: (0, 0)),    # b2 (resident)
            ],
            out_specs=pl.BlockSpec((tm, E), lambda i, j: (i, 0)),
            scratch_shapes=[pltpu.VMEM((tm, E), jnp.float32)],
        ),
        compiler_params=pltpu.CompilerParams(
            dimension_semantics=("parallel", "arbitrary"),
            vmem_limit_bytes=_VMEM_LIMIT,
        ),
        cost_estimate=cost,
    )(x2, w1, b1_2, w2, b2_2)

    if m_pad != M:
        out = out[:M]
    return out.reshape(orig_shape)


if __name__ == "__main__":
    # Small shapes implied by the module: batch=2, seq=8, embedding_dim=32,
    # mlp_dim=128 (standard 4x expansion).
    key = jax.random.PRNGKey(0)
    k1, k2, k3, k4, k5 = jax.random.split(key, 5)
    B, S, E, D = 2, 8, 32, 128

    x = jax.random.normal(k1, (B, S, E), dtype=jnp.float32)
    lim1 = 1.0 / (E ** 0.5)
    w1 = jax.random.uniform(k2, (E, D), jnp.float32, -lim1, lim1)
    b1 = jax.random.uniform(k3, (D,), jnp.float32, -lim1, lim1)
    lim2 = 1.0 / (D ** 0.5)
    w2 = jax.random.uniform(k4, (D, E), jnp.float32, -lim2, lim2)
    b2 = jax.random.uniform(k5, (E,), jnp.float32, -lim2, lim2)

    out = mlp_block(x, w1, b1, w2, b2)
    out = jax.block_until_ready(out)

    # Plain-JAX reference (same math as the PyTorch module, exact GELU).
    xf = x.reshape(-1, E)
    h_ref = jnp.dot(xf, w1, precision=jax.lax.Precision.HIGHEST) + b1
    h_ref = jax.nn.gelu(h_ref, approximate=False)
    ref = jnp.dot(h_ref, w2, precision=jax.lax.Precision.HIGHEST) + b2
    ref = ref.reshape(B, S, E)

    assert out.shape == (B, S, E)
    assert jnp.allclose(out, ref, atol=1e-4, rtol=1e-4), "mismatch vs reference"

    print("KERNEL_OK")
</pallas_src>

<mosaic_0001>
module attributes {stable_mosaic.version = 11 : i64} {
  func.func @_mlp_kernel(%arg0: i32, %arg1: i32, %arg2: memref<16x32xf32, #tpu.memory_space<vmem>>, %arg3: memref<32x128xf32, #tpu.memory_space<vmem>>, %arg4: memref<1x128xf32, #tpu.memory_space<vmem>>, %arg5: memref<128x32xf32, #tpu.memory_space<vmem>>, %arg6: memref<1x32xf32, #tpu.memory_space<vmem>>, %arg7: memref<16x32xf32, #tpu.memory_space<vmem>>, %arg8: memref<16x32xf32, #tpu.memory_space<vmem>>) attributes {dimension_semantics = [#tpu.dimension_semantics<parallel>, #tpu.dimension_semantics<arbitrary>], iteration_bounds = array<i64: 1, 1>, scalar_prefetch = 0 : i64, scratch_operands = 1 : i64, tpu.core_type = #tpu.core_type<tc>, window_params = [{transform_indices = @transform_0, window_bounds = array<i64: 16, 32>}, {transform_indices = @transform_1, window_bounds = array<i64: 32, 128>}, {transform_indices = @transform_2, window_bounds = array<i64: 1, 128>}, {transform_indices = @transform_3, window_bounds = array<i64: 128, 32>}, {pipeline_mode = #tpu.pipeline_mode<synchronous>, transform_indices = @transform_4, window_bounds = array<i64: 1, 32>}, {transform_indices = @transform_5, window_bounds = array<i64: 16, 32>}]} {
    %c0_i32 = arith.constant 0 : i32
    %0 = arith.cmpi eq, %arg1, %c0_i32 : i32
    %1 = arith.extui %0 : i1 to i32
    %c0_i32_0 = arith.constant 0 : i32
    %2 = arith.cmpi ne, %1, %c0_i32_0 : i32
    scf.if %2 {
      %cst_30 = arith.constant 0.000000e+00 : f32
      %57 = vector.broadcast %cst_30 : f32 to vector<16x32xf32>
      %c0_31 = arith.constant 0 : index
      %c0_32 = arith.constant 0 : index
      %58 = vector.load %arg8[%c0_31, %c0_32] : memref<16x32xf32, #tpu.memory_space<vmem>>, vector<16x32xf32>
      tpu.vector_store %arg8[%c0_31, %c0_32], %57 {strides = array<i32>} : memref<16x32xf32, #tpu.memory_space<vmem>>, vector<16x32xf32>,
    } else {
    }
    %c0 = arith.constant 0 : index
    %c0_1 = arith.constant 0 : index
    %3 = vector.load %arg2[%c0, %c0_1] : memref<16x32xf32, #tpu.memory_space<vmem>>, vector<16x32xf32>
    %c0_2 = arith.constant 0 : index
    %c0_3 = arith.constant 0 : index
    %4 = vector.load %arg3[%c0_2, %c0_3] : memref<32x128xf32, #tpu.memory_space<vmem>>, vector<32x128xf32>
    %cst = arith.constant dense<0.000000e+00> : vector<16x128xf32>
    %5 = tpu.matmul %3, %4, %cst {dimension_numbers = #tpu.dot_dimension_numbers<[1], [0], [0], [1], [0, 0, 1, 1], [], []>, precision = #tpu.contract_precision<fp32>} : vector<16x32xf32>, vector<32x128xf32>, vector<16x128xf32> -> vector<16x128xf32>
    %c0_4 = arith.constant 0 : index
    %c0_5 = arith.constant 0 : index
    %6 = vector.load %arg4[%c0_4, %c0_5] : memref<1x128xf32, #tpu.memory_space<vmem>>, vector<1x128xf32>
    %7 = vector.broadcast %6 : vector<1x128xf32> to vector<16x128xf32>
    %8 = arith.addf %5, %7 : vector<16x128xf32>
    %cst_6 = arith.constant 5.000000e-01 : f32
    %9 = vector.broadcast %cst_6 : f32 to vector<16x128xf32>
    %10 = arith.mulf %9, %8 : vector<16x128xf32>
    %cst_7 = arith.constant 0.707106769 : f32
    %11 = vector.broadcast %cst_7 : f32 to vector<16x128xf32>
    %12 = arith.mulf %8, %11 : vector<16x128xf32>
    %13 = math.absf %12 : vector<16x128xf32>
    %cst_8 = arith.constant 0.327591091 : f32
    %14 = vector.broadcast %cst_8 : f32 to vector<16x128xf32>
    %15 = arith.mulf %14, %13 : vector<16x128xf32>
    %cst_9 = arith.constant 1.000000e+00 : f32
    %16 = vector.broadcast %cst_9 : f32 to vector<16x128xf32>
    %17 = arith.addf %16, %15 : vector<16x128xf32>
    %cst_10 = arith.constant 1.000000e+00 : f32
    %18 = vector.broadcast %cst_10 : f32 to vector<16x128xf32>
    %19 = arith.divf %18, %17 : vector<16x128xf32>
    %cst_11 = arith.constant 1.06140542 : f32
    %20 = vector.broadcast %cst_11 : f32 to vector<16x128xf32>
    %21 = arith.mulf %19, %20 : vector<16x128xf32>
    %cst_12 = arith.constant -1.45315206 : f32
    %22 = vector.broadcast %cst_12 : f32 to vector<16x128xf32>
    %23 = arith.addf %22, %21 : vector<16x128xf32>
    %24 = arith.mulf %19, %23 : vector<16x128xf32>
    %cst_13 = arith.constant 1.42141378 : f32
    %25 = vector.broadcast %cst_13 : f32 to vector<16x128xf32>
    %26 = arith.addf %25, %24 : vector<16x128xf32>
    %27 = arith.mulf %19, %26 : vector<16x128xf32>
    %cst_14 = arith.constant -0.284496725 : f32
    %28 = vector.broadcast %cst_14 : f32 to vector<16x128xf32>
    %29 = arith.addf %28, %27 : vector<16x128xf32>
    %30 = arith.mulf %19, %29 : vector<16x128xf32>
    %cst_15 = arith.constant 0.254829586 : f32
    %31 = vector.broadcast %cst_15 : f32 to vector<16x128xf32>
    %32 = arith.addf %31, %30 : vector<16x128xf32>
    %33 = arith.mulf %19, %32 : vector<16x128xf32>
    %cst_16 = arith.constant 0.000000e+00 : f32
    %34 = vector.broadcast %cst_16 : f32 to vector<16x128xf32>
    %35 = arith.subf %34, %13 : vector<16x128xf32>
    %36 = arith.mulf %35, %13 : vector<16x128xf32>
    %37 = math.exp %36 : vector<16x128xf32>
    %38 = arith.mulf %33, %37 : vector<16x128xf32>
    %cst_17 = arith.constant 1.000000e+00 : f32
    %39 = vector.broadcast %cst_17 : f32 to vector<16x128xf32>
    %40 = arith.subf %39, %38 : vector<16x128xf32>
    %cst_18 = arith.constant 0.000000e+00 : f32
    %41 = vector.broadcast %cst_18 : f32 to vector<16x128xf32>
    %42 = arith.cmpf olt, %12, %41 : vector<16x128xf32>
    %cst_19 = arith.constant 0.000000e+00 : f32
    %43 = vector.broadcast %cst_19 : f32 to vector<16x128xf32>
    %44 = arith.subf %43, %40 : vector<16x128xf32>
    %45 = arith.select %42, %44, %40 : vector<16x128xi1>, vector<16x128xf32>
    %cst_20 = arith.constant 1.000000e+00 : f32
    %46 = vector.broadcast %cst_20 : f32 to vector<16x128xf32>
    %47 = arith.addf %46, %45 : vector<16x128xf32>
    %48 = arith.mulf %10, %47 : vector<16x128xf32>
    %c0_21 = arith.constant 0 : index
    %c0_22 = arith.constant 0 : index
    %49 = vector.load %arg8[%c0_21, %c0_22] : memref<16x32xf32, #tpu.memory_space<vmem>>, vector<16x32xf32>
    %c0_23 = arith.constant 0 : index
    %c0_24 = arith.constant 0 : index
    %50 = vector.load %arg5[%c0_23, %c0_24] : memref<128x32xf32, #tpu.memory_space<vmem>>, vector<128x32xf32>
    %cst_25 = arith.constant dense<0.000000e+00> : vector<16x32xf32>
    %51 = tpu.matmul %48, %50, %cst_25 {dimension_numbers = #tpu.dot_dimension_numbers<[1], [0], [0], [1], [0, 0, 1, 1], [], []>, precision = #tpu.contract_precision<fp32>} : vector<16x128xf32>, vector<128x32xf32>, vector<16x32xf32> -> vector<16x32xf32>
    %52 = arith.addf %49, %51 : vector<16x32xf32>
    %c0_26 = arith.constant 0 : index
    %c0_27 = arith.constant 0 : index
    %53 = vector.load %arg8[%c0_26, %c0_27] : memref<16x32xf32, #tpu.memory_space<vmem>>, vector<16x32xf32>
    tpu.vector_store %arg8[%c0_26, %c0_27], %52 {strides = array<i32>} : memref<16x32xf32, #tpu.memory_space<vmem>>, vector<16x32xf32>,
    %c0_i32_28 = arith.constant 0 : i32
    %54 = arith.cmpi eq, %arg1, %c0_i32_28 : i32
    %55 = arith.extui %54 : i1 to i32
    %c0_i32_29 = arith.constant 0 : i32
    %56 = arith.cmpi ne, %55, %c0_i32_29 : i32
    scf.if %56 {
      %c0_30 = arith.constant 0 : index
      %c0_31 = arith.constant 0 : index
      %57 = vector.load %arg8[%c0_30, %c0_31] : memref<16x32xf32, #tpu.memory_space<vmem>>, vector<16x32xf32>
      %c0_32 = arith.constant 0 : index
      %c0_33 = arith.constant 0 : index
      %58 = vector.load %arg6[%c0_32, %c0_33] : memref<1x32xf32, #tpu.memory_space<vmem>>, vector<1x32xf32>
      %59 = vector.broadcast %58 : vector<1x32xf32> to vector<16x32xf32>
      %60 = arith.addf %57, %59 : vector<16x32xf32>
      %c0_34 = arith.constant 0 : index
      %c0_35 = arith.constant 0 : index
      %61 = vector.load %arg7[%c0_34, %c0_35] : memref<16x32xf32, #tpu.memory_space<vmem>>, vector<16x32xf32>
      tpu.vector_store %arg7[%c0_34, %c0_35], %60 {strides = array<i32>} : memref<16x32xf32, #tpu.memory_space<vmem>>, vector<16x32xf32>,
    } else {
    }
    return
  }
  func.func @transform_0(%arg0: i32, %arg1: i32) -> (i32, i32) {
    %c0_i32 = arith.constant 0 : i32
    %c0_i32_0 = arith.constant 0 : i32
    return %arg0, %c0_i32 : i32, i32
  }
  func.func @transform_1(%arg0: i32, %arg1: i32) -> (i32, i32) {
    %c0_i32 = arith.constant 0 : i32
    %c0_i32_0 = arith.constant 0 : i32
    return %c0_i32, %arg1 : i32, i32
  }
  func.func @transform_2(%arg0: i32, %arg1: i32) -> (i32, i32) {
    %c0_i32 = arith.constant 0 : i32
    %c0_i32_0 = arith.constant 0 : i32
    return %c0_i32, %arg1 : i32, i32
  }
  func.func @transform_3(%arg0: i32, %arg1: i32) -> (i32, i32) {
    %c0_i32 = arith.constant 0 : i32
    %c0_i32_0 = arith.constant 0 : i32
    return %arg1, %c0_i32 : i32, i32
  }
  func.func @transform_4(%arg0: i32, %arg1: i32) -> (i32, i32) {
    %c0_i32 = arith.constant 0 : i32
    %c0_i32_0 = arith.constant 0 : i32
    %c0_i32_1 = arith.constant 0 : i32
    return %c0_i32, %c0_i32_0 : i32, i32
  }
  func.func @transform_5(%arg0: i32, %arg1: i32) -> (i32, i32) {
    %c0_i32 = arith.constant 0 : i32
    %c0_i32_0 = arith.constant 0 : i32
    return %arg0, %c0_i32 : i32, i32
  }
}

</mosaic_0001>

<bundles_post_ra>
// kernel: tpu_custom_call.1
= control target key start
LH: loop header
LB: loop body
LE: loop exit
PB: predicated region body
PF: predicated region fallthrough
CT: control target
= control target key end

     0   :  { %vm25_vm0 = vcmask 261120   ;;  %s1189_s0 = inlined_call_operand.vmem [shape: f32[16,32], index: 0, kind: input, shape index: {}]   ;;  %s1190_s1 = inlined_call_operand.vmem [shape: f32[32,128], index: 1, kind: input, shape index: {}]   ;;  %s1191_s2 = inlined_call_operand.vmem [shape: f32[1,128], index: 2, kind: input, shape index: {}]   ;;  %s1192_s3 = inlined_call_operand.vmem [shape: f32[128,32], index: 3, kind: input, shape index: {}]   ;;  %s1193_s4 = inlined_call_operand.vmem [shape: f32[1,32], index: 4, kind: input, shape index: {}]   ;;  %s1194_s5 = inlined_call_operand.hbm [shape: f32[16,32], index: 5, kind: output, shape index: {}]  }
   0x1   :  { %v33_v0 = vld [vmem:[%s1190_s1 + $0x18] sm:$0xff]  ;;  %v32_v1 = vld [vmem:[%s1190_s1 + $0x10] sm:$0xff]  ;;  %v31_v2 = vld [vmem:[%s1190_s1 + $0x8] sm:$0xff] }
   0x2   :  { %v57_v3 = vand.u32 4294901760, %v33_v0  ;;  %v59_v4 = vand.u32 4294901760, %v32_v1  ;;  %v61_v5 = vand.u32 4294901760, %v31_v2  ;;  %v30_v6 = vld [vmem:[%s1190_s1] sm:$0xff]  ;;  %v29_v8 = vld [vmem:[%s1189_s0 + $0x8] sm:$0xff] }
   0x3   :  { %v28_v7 = vld [vmem:[%s1189_s0] sm:$0xff]  ;;  %v63_v9 = vand.u32 4294901760, %v30_v6  ;;  %v43_v11 = vsel %vm25_vm0, %v29_v8, 0 }
   0x4   :  { %v40_v10 = vsel %vm25_vm0, %v28_v7, 0  ;;  %58 = vmatpush.msra.mxu0 %v57_v3  ;;  %v95_v12 = vsub.f32 %v33_v0, %v57_v3  ;;  %v101_v13 = vsub.f32 %v32_v1, %v59_v4  ;;  %175 = vmatpush.msra.mxu3 %v57_v3  ;;  %v107_v14 = vsub.f32 %v31_v2, %v61_v5 }
   0x5   :  { %v65_v15 = vand.u32 4294901760, %v40_v10 }
   0x6   :  { %10 = vsyncpa [#allocation4], 0  ;;  %v113_v16 = vsub.f32 %v30_v6, %v63_v9  ;;  %v73_v17 = vand.u32 4294901760, %v43_v11  ;;  %60 = vmatpush.msra.mxu0 %v59_v4  ;;  %141 = vmatpush.msra.mxu2 %v95_v12  ;;  %v96_v18 = vand.u32 4294901760, %v95_v12  ;;  %v102_v20 = vand.u32 4294901760, %v101_v13  ;;  %v358_v38 = vld [vmem:[%s1192_s3 + $0x78] sm:$0xff] }
   0x7   :  { %v66_v19 = vsub.f32 %v40_v10, %v65_v15  ;;  %v108_v21 = vand.u32 4294901760, %v107_v14  ;;  %177 = vmatpush.msra.mxu3 %v59_v4  ;;  %v863_v39 = vand.u32 4294901760, %v358_v38  ;;  %v357_v40 = vld [vmem:[%s1192_s3 + $0x70] sm:$0xff]  ;;  %v356_v43 = vld [vmem:[%s1192_s3 + $0x68] sm:$0xff]  ;;  %v355_v47 = vld [vmem:[%s1192_s3 + $0x60] sm:$0xff]  ;;  %s807_s10 = smov [#allocation3]  }
   0x8   :  { %v114_v22 = vand.u32 4294901760, %v113_v16  ;;  %v74_v23 = vsub.f32 %v43_v11, %v73_v17  ;;  %62 = vmatpush.msra.mxu0 %v61_v5  ;;  %144 = vmatpush.msra.mxu2 %v101_v13  ;;  %v97_v24 = vsub.f32 %v95_v12, %v96_v18  ;;  %v103_v26 = vsub.f32 %v101_v13, %v102_v20  ;;  %v354_v53 = vld [vmem:[%s1192_s3 + $0x58] sm:$0xff]  ;;  %v770_v54 = vld [vmem:[%s1191_s2] ss:$0 sm:$0xff]  ;;  %v353_v60 = vld [vmem:[%s1192_s3 + $0x50] sm:$0xff]  ;;  %s752_s11 = sshll.u32 %s807_s10, 4  ;;  %s753_s11 = int_to_ptr.vmem [resolvable:$true] %s752_s11 }
   0x9   :  { %v67_v25 = vand.u32 4294901760, %v66_v19  ;;  %v109_v27 = vsub.f32 %v107_v14, %v108_v21  ;;  %179 = vmatpush.msra.mxu3 %v61_v5  ;;  %v869_v41 = vsub.f32 %v358_v38, %v863_v39  ;;  %v871_v42 = vand.u32 4294901760, %v357_v40  ;;  %v351_v10 = vld [vmem:[%s1192_s3 + $0x40] sm:$0xff]  ;;  %s754_s14 = sshll.u32 %s1194_s5, 4  ;;  %s809_s15 = smov 8   ;;  %s755_s14 = int_to_ptr.hbm [resolvable:$true] %s754_s14 }
   0xa   :  { %v115_v28 = vsub.f32 %v113_v16, %v114_v22  ;;  %64 = vmatpush.msra.mxu0 %v63_v9  ;;  %v98_v29 = vand.u32 4294901760, %v97_v24  ;;  %147 = vmatpush.msra.mxu2 %v107_v14  ;;  %v104_v31 = vand.u32 4294901760, %v103_v26  ;;  %v75_v32 = vand.u32 4294901760, %v74_v23 }
   0xb   :  { %v68_v30 = vsub.f32 %v66_v19, %v67_v25  ;;  %181 = vmatpush.msra.mxu3 %v63_v9  ;;  %v110_v34 = vand.u32 4294901760, %v109_v27  ;;  %v410_v44 = vand.u32 4294901760, %v869_v41  ;;  %v880_v45 = vsub.f32 %v357_v40, %v871_v42 }
   0xc   :  { %210 = vmatpush.msrb.mxu0 %v96_v18  ;;  %99 = vmatpush.msra.mxu1 %v98_v29  ;;  %v116_v35 = vand.u32 4294901760, %v115_v28  ;;  %v76_v36 = vsub.f32 %v74_v23, %v75_v32  ;;  %v882_v46 = vand.u32 4294901760, %v356_v43  ;;  %v897_v52 = vand.u32 4294901760, %v355_v47  ;;  %v350_v18 = vld [vmem:[%s1192_s3 + $0x38] sm:$0xff] }
   0xd   :  { %v69_v33 = vand.u32 4294901760, %v68_v30  ;;  %150 = vmatpush.msra.mxu2 %v113_v16  ;;  %185 = vmatmul.f32.vlgmr.msra.gmra.mxu3 %v67_v25  ;;  %v411_v49 = vsub.f32 %v869_v41, %v410_v44  ;;  %v416_v50 = vand.u32 4294901760, %v880_v45  ;;  %v917_v59 = vand.u32 4294901760, %v354_v53  ;;  %v349_v25 = vld [vmem:[%s1192_s3 + $0x30] sm:$0xff] }
   0xe   :  { %153 = vmatmul.f32.vlgmr.msra.gmra.mxu2 %v66_v19  ;;  %105 = vmatpush.msra.mxu1 %v104_v31  ;;  %v77_v37 = vand.u32 4294901760, %v76_v36  ;;  %v895_v51 = vsub.f32 %v356_v43, %v882_v46  ;;  %v913_v58 = vsub.f32 %v355_v47, %v897_v52  ;;  %v927_v0 = vand.u32 4294901760, %v353_v60  ;;  %v347_v47 = vld [vmem:[%s1192_s3 + $0x20] sm:$0xff] }
   0xf   :  { %70 = vmatmul.f32.vlgmr.msra.gmra.mxu0 %v69_v33  ;;  %360 = vmatpush.msrb.mxu2 %v863_v39  ;;  %v412_v55 = vand.u32 4294901760, %v411_v49  ;;  %v417_v56 = vsub.f32 %v880_v45, %v416_v50  ;;  %v931_v2 = vsub.f32 %v354_v53, %v917_v59  ;;  %v986_v29 = vand.u32 4294901760, %v349_v25 }
  0x10   :  { %214 = vmatpush.msrb.mxu0 %v102_v20  ;;  %111 = vmatpush.msra.mxu1 %v110_v34  ;;  %v422_v57 = vand.u32 4294901760, %v895_v51  ;;  %v428_v63 = vand.u32 4294901760, %v913_v58  ;;  %v942_v7 = vsub.f32 %v353_v60, %v927_v0  ;;  %v348_v34 = vld [vmem:[%s1192_s3 + $0x28] sm:$0xff]  ;;  %v1020_v60 = vand.u32 4294901760, %v347_v47 }
  0x11   :  { %362 = vmatpush.msrb.mxu2 %v871_v42  ;;  %413 = vmatpush.msrb.mxu3 %v412_v55  ;;  %v418_v61 = vand.u32 4294901760, %v417_v56  ;;  %v434_v8 = vand.u32 4294901760, %v931_v2  ;;  %v1001_v38 = vsub.f32 %v349_v25, %v986_v29  ;;  %v1005_v43 = vand.u32 4294901760, %v348_v34 }
  0x12   :  { %218 = vmatpush.msrb.mxu0 %v108_v21  ;;  %117 = vmatpush.msra.mxu1 %v116_v35  ;;  %v423_v62 = vsub.f32 %v895_v51, %v422_v57  ;;  %v429_v6 = vsub.f32 %v913_v58, %v428_v63  ;;  %v440_v14 = vand.u32 4294901760, %v942_v7 }
  0x13   :  { %119 = vmatmul.f32.vlgmr.msra.gmra.mxu1 %v65_v15  ;;  %364 = vmatpush.msrb.mxu2 %v882_v46  ;;  %v435_v16 = vsub.f32 %v931_v2, %v434_v8  ;;  %v1018_v56 = vsub.f32 %v348_v34, %v1005_v43 }
  0x14   :  { %222 = vmatpush.msrb.mxu0 %v114_v22  ;;  %245 = vmatpush.msrb.mxu1 %v57_v3  ;;  %v352_v3 = vld [vmem:[%s1192_s3 + $0x48] sm:$0xff]  ;;  %v430_v13 = vand.u32 4294901760, %v429_v6  ;;  %v441_v20 = vsub.f32 %v942_v7, %v440_v14  ;;  %v973_v22 = vand.u32 4294901760, %v350_v18 }
  0x15   :  { %191 = vmatmul.f32.gmra.mxu3 %v75_v32  ;;  %366 = vmatpush.msrb.mxu2 %v897_v52  ;;  %v470_v6 = vand.u32 4294901760, %v1018_v56 }
  0x16   :  { %158 = vmatmul.f32.gmra.mxu2 %v74_v23  ;;  %247 = vmatpush.msrb.mxu1 %v59_v4  ;;  %v436_v23 = vand.u32 4294901760, %v435_v16  ;;  %v442_v26 = vand.u32 4294901760, %v441_v20  ;;  %v984_v28 = vsub.f32 %v350_v18, %v973_v22 }
  0x17   :  { %78 = vmatmul.f32.gmra.mxu0 %v77_v37  ;;  %368 = vmatpush.msrb.mxu2 %v917_v59 }
  0x18   :  { %249 = vmatpush.msrb.mxu1 %v61_v5  ;;  %515 = vmatpush.msra.mxu0 %v869_v41  ;;  %v424_v5 = vand.u32 4294901760, %v423_v62  ;;  %v458_v37 = vand.u32 4294901760, %v984_v28 }
  0x19   :  { %419 = vmatpush.msrb.mxu3 %v418_v61  ;;  %370 = vmatpush.msrb.mxu2 %v927_v0  ;;  %v346_v61 = vld [vmem:[%s1192_s3 + $0x18] sm:$0xff] }
  0x1a   :  { %251 = vmatpush.msrb.mxu1 %v63_v9  ;;  %518 = vmatpush.msra.mxu0 %v880_v45  ;;  %v945_v9 = vand.u32 4294901760, %v352_v3  ;;  %v459_v53 = vsub.f32 %v984_v28, %v458_v37 }
  0x1b   :  { %123 = vmatmul.f32.gmra.mxu1 %v73_v17  ;;  %425 = vmatpush.msrb.mxu3 %v424_v5  ;;  %v1029_v5 = vand.u32 4294901760, %v346_v61 }
  0x1c   :  { %573 = vmatpush.msra.mxu1 %v863_v39  ;;  %521 = vmatpush.msra.mxu0 %v895_v51 }
  0x1d   :  { %372 = vmatpush.msrb.mxu2 %v945_v9  ;;  %431 = vmatpush.msrb.mxu3 %v430_v13  ;;  %v1042_v16 = vsub.f32 %v346_v61, %v1029_v5 }
  0x1e   :  { %575 = vmatpush.msra.mxu1 %v871_v42  ;;  %524 = vmatpush.msra.mxu0 %v913_v58 }
  0x1f   :  { %224 = vmatmul.f32.vlgmr.msrb.gmra.mxu0 %v65_v15  ;;  %437 = vmatpush.msrb.mxu3 %v436_v23  ;;  %v471_v23 = vsub.f32 %v1018_v56, %v470_v6 }
  0x20   :  { %577 = vmatpush.msra.mxu1 %v882_v46  ;;  %527 = vmatpush.msra.mxu0 %v931_v2 }
  0x21   :  { %443 = vmatpush.msrb.mxu3 %v442_v26  ;;  %v344_v26 = vld [vmem:[%s1192_s3 + $0x8] sm:$0xff] }
  0x22   :  { %579 = vmatpush.msra.mxu1 %v897_v52  ;;  %530 = vmatpush.msra.mxu0 %v942_v7 }
  0x23   :  { %253 = vmatmul.f32.vlgmr.msrb.gmra.mxu1 %v65_v15  ;;  %v953_v15 = vand.u32 4294901760, %v351_v10 }
  0x24   :  { %581 = vmatpush.msra.mxu1 %v917_v59 }
  0x25   :  { %v971_v21 = vsub.f32 %v351_v10, %v953_v15  ;;  %374 = vmatpush.msrb.mxu2 %v953_v15  ;;  %v1035_v10 = vsub.f32 %v347_v47, %v1020_v60 }
  0x26   :  { %583 = vmatpush.msra.mxu1 %v927_v0 }
  0x27   :  { %228 = vmatmul.f32.gmra.mxu0 %v73_v17  ;;  %v452_v27 = vand.u32 4294901760, %v971_v21  ;;  %376 = vmatpush.msrb.mxu2 %v973_v22  ;;  %v476_v25 = vand.u32 4294901760, %v1035_v10 }
  0x28   :  { %585 = vmatpush.msra.mxu1 %v945_v9 }
  0x29   :  { %v453_v36 = vsub.f32 %v971_v21, %v452_v27  ;;  %378 = vmatpush.msrb.mxu2 %v986_v29 }
  0x2a   :  { %587 = vmatpush.msra.mxu1 %v953_v15 }
  0x2b   :  { %257 = vmatmul.f32.gmra.mxu1 %v73_v17  ;;  %v960_v17 = vsub.f32 %v352_v3, %v945_v9  ;;  %v454_v49 = vand.u32 4294901760, %v453_v36  ;;  %380 = vmatpush.msrb.mxu2 %v1005_v43  ;;  %v460_v3 = vand.u32 4294901760, %v459_v53  ;;  %v477_v36 = vsub.f32 %v1035_v10, %v476_v25 }
  0x2c   :  { %589 = vmatpush.msra.mxu1 %v973_v22 }
  0x2d   :  { %v446_v24 = vand.u32 4294901760, %v960_v17  ;;  %533 = vmatpush.msra.mxu0 %v960_v17  ;;  %382 = vmatpush.msrb.mxu2 %v1020_v60 }
  0x2e   :  { %591 = vmatpush.msra.mxu1 %v986_v29 }
  0x2f   :  { %v447_v33 = vsub.f32 %v960_v17, %v446_v24  ;;  %536 = vmatpush.msra.mxu0 %v971_v21  ;;  %384 = vmatpush.msrb.mxu2 %v1029_v5 }
  0x30   :  { %593 = vmatpush.msra.mxu1 %v1005_v43 }
  0x31   :  { %v448_v40 = vand.u32 4294901760, %v447_v33  ;;  %539 = vmatpush.msra.mxu0 %v984_v28  ;;  %v1062_v33 = vand.u32 4294901760, %v344_v26 }
  0x32   :  { %595 = vmatpush.msra.mxu1 %v1020_v60 }
  0x33   :  { %449 = vmatpush.msrb.mxu3 %v448_v40  ;;  %542 = vmatpush.msra.mxu0 %v1001_v38  ;;  %v343_v40 = vld [vmem:[%s1192_s3] sm:$0xff]  ;;  %v1083_v61 = vsub.f32 %v344_v26, %v1062_v33 }
  0x34   :  { %597 = vmatpush.msra.mxu1 %v1029_v5 }
  0x35   :  { %455 = vmatpush.msrb.mxu3 %v454_v49  ;;  %545 = vmatpush.msra.mxu0 %v1018_v56 }
  0x37   :  { %461 = vmatpush.msrb.mxu3 %v460_v3  ;;  %548 = vmatpush.msra.mxu0 %v1035_v10 }
  0x39   :  { %551 = vmatpush.msra.mxu0 %v1042_v16 }
  0x8c   :  { %v71_v48 = vpop.f32.mrf.mxu0 }
  0x8d   :  { %v72_v4 = vadd.f32 %v770_v54, %v71_v48 }
  0x90   :  { %v120_v1 = vpop.f32.mrf.mxu1  ;;  %v186_v31 = vpop.f32.mrf.mxu3 }
  0x91   :  { %v154_v12 = vpop.f32.mrf.mxu2  ;;  %v121_v19 = vadd.f32 %v120_v1, %v72_v4 }
  0x93   :  { %v155_v35 = vadd.f32 %v154_v12, %v121_v19 }
  0x94   :  { %v79_v11 = vpop.f32.mrf.mxu0 }
  0x95   :  { %v80_v30 = vadd.f32 %v770_v54, %v79_v11  ;;  %v464_v54 = vand.u32 4294901760, %v1001_v38  ;;  %v187_v62 = vadd.f32 %v186_v31, %v155_v35  ;;  %v345_v11 = vld [vmem:[%s1192_s3 + $0x10] sm:$0xff]  ;;  %v482_v31 = vand.u32 4294901760, %v1042_v16 }
  0x96   :  { %v1044_v18 = vand.u32 4294901760, %v345_v11  ;;  %v472_v35 = vand.u32 4294901760, %v471_v23 }
  0x97   :  { %v465_v4 = vsub.f32 %v1001_v38, %v464_v54 }
  0x98   :  { %v124_v32 = vpop.f32.mrf.mxu1  ;;  %v192_v34 = vpop.f32.mrf.mxu3  ;;  %386 = vmatpush.msrb.mxu2 %v1044_v18  ;;  %599 = vmatpush.msra.mxu1 %v1044_v18 }
  0x99   :  { %v125_v55 = vadd.f32 %v124_v32, %v80_v30  ;;  %v159_v1 = vpop.f32.mrf.mxu2  ;;  %v466_v13 = vand.u32 4294901760, %v465_v4  ;;  %v1060_v32 = vsub.f32 %v345_v11, %v1044_v18 }
  0x9a   :  { %388 = vmatpush.msrb.mxu2 %v1062_v33  ;;  %601 = vmatpush.msra.mxu1 %v1062_v33 }
  0x9b   :  { %v160_v19 = vadd.f32 %v159_v1, %v125_v55  ;;  %467 = vmatpush.msrb.mxu3 %v466_v13  ;;  %v488_v49 = vand.u32 4294901760, %v1060_v32  ;;  %v478_v55 = vand.u32 4294901760, %v477_v36  ;;  %554 = vmatpush.msra.mxu0 %v1060_v32 }
  0x9c   :  { %v225_v48 = vpop.f32.mrf.mxu0 }
  0x9d   :  { %v226_v12 = vadd.f32 %v225_v48, %v187_v62  ;;  %v483_v48 = vsub.f32 %v1042_v16, %v482_v31  ;;  %473 = vmatpush.msrb.mxu3 %v472_v35  ;;  %v1085_v62 = vand.u32 4294901760, %v343_v40  ;;  %v193_v1 = vadd.f32 %v192_v34, %v160_v19  ;;  %557 = vmatpush.msra.mxu0 %v1083_v61 }
  0x9e   :  { %v489_v11 = vsub.f32 %v1060_v32, %v488_v49 }
  0x9f   :  { %v484_v4 = vand.u32 4294901760, %v483_v48  ;;  %479 = vmatpush.msrb.mxu3 %v478_v55  ;;  %v1098_v13 = vsub.f32 %v343_v40, %v1085_v62  ;;  %390 = vmatpush.msrb.mxu2 %v1085_v62 }
  0xa0   :  { %v254_v20 = vpop.f32.mrf.mxu1  ;;  %v490_v23 = vand.u32 4294901760, %v489_v11  ;;  %603 = vmatpush.msra.mxu1 %v1085_v62 }
  0xa1   :  { %v1056_v30 = vadd.f32 %v254_v20, %v226_v12  ;;  %v494_v12 = vand.u32 4294901760, %v1083_v61  ;;  %620 = vmatpush.msra.mxu2 %v410_v44  ;;  %485 = vmatpush.msrb.mxu3 %v484_v4  ;;  %v500_v35 = vand.u32 4294901760, %v1098_v13 }
  0xa2   :  { %560 = vmatpush.msra.mxu0 %v1098_v13 }
  0xa3   :  { %v1074_v47 = vmul.f32 0.70710677, %v1056_v30  ;;  %v495_v34 = vsub.f32 %v1083_v61, %v494_v12  ;;  %624 = vmatpush.msra.mxu2 %v416_v50  ;;  %491 = vmatpush.msrb.mxu3 %v490_v23  ;;  %v501_v44 = vsub.f32 %v1098_v13, %v500_v35 }
  0xa4   :  { %v229_v53 = vpop.f32.mrf.mxu0 }
  0xa5   :  { %v1089_v3 = vand.u32 2147483647, %v1074_v47  ;;  %v230_v20 = vadd.f32 %v229_v53, %v193_v1  ;;  %v496_v41 = vand.u32 4294901760, %v495_v34  ;;  %628 = vmatpush.msra.mxu2 %v422_v57  ;;  %v502_v53 = vand.u32 4294901760, %v501_v44 }
  0xa6   :  { %vm331_vm9 = vcmp.lt.f32.partialorder %v1074_v47, 0.0 }
  0xa7   :  { %v267_v19 = vmul.f32 0.3275911, %v1089_v3  ;;  %497 = vmatpush.msrb.mxu3 %v496_v41  ;;  %632 = vmatpush.msra.mxu2 %v428_v63  ;;  %v319_v17 = vsub.f32 0.0, %v1089_v3 }
  0xa8   :  { %v258_v26 = vpop.f32.mrf.mxu1 }
  0xa9   :  { %v269_v36 = vadd.f32 1.0, %v267_v19  ;;  %v1110_v40 = vadd.f32 %v258_v26, %v230_v20  ;;  %503 = vmatpush.msrb.mxu3 %v502_v53  ;;  %636 = vmatpush.msra.mxu2 %v434_v8  ;;  %v321_v28 = vmul.f32 %v319_v17, %v1089_v3  ;;  %v261_v26 = vmul.f32 0.5, %v1056_v30 }
  0xab   :  { %772 = vrcp.f32 %v269_v36  ;;  %v1121_v48 = vmul.f32 0.70710677, %v1110_v40  ;;  %691 = vmatpush.msra.mxu3 %v863_v39  ;;  %640 = vmatpush.msra.mxu2 %v440_v14  ;;  %v282_v39 = vand.u32 2147483648, %v269_v36  ;;  %vm276_vm2 = vweird.f32 %v269_v36 }
  0xac   :  { %v262_v47 = vmul.f32 0.5, %v1110_v40  ;;  %v806_v40 = vmov 0.0  }
  0xad   :  { %v1126_v45 = vand.u32 2147483647, %v1121_v48  ;;  %693 = vmatpush.msra.mxu3 %v871_v42  ;;  %644 = vmatpush.msra.mxu2 %v446_v24  ;;  %v280_v42 = vand.u32 2147483647, %v269_v36  ;;  %v283_v7 = vor.u32 1.1754944e-38, %v282_v39  ;;  %vm332_vm10 = vcmp.lt.f32.partialorder %v1121_v48, 0.0 }
  0xae   :  { %26 = vst.msk [vmem:[#allocation2] sm:$0xff] %vm25_vm0, %v806_v40 }
  0xaf   :  { %v268_v50 = vmul.f32 0.3275911, %v1126_v45  ;;  %695 = vmatpush.msra.mxu3 %v882_v46  ;;  %648 = vmatpush.msra.mxu2 %v452_v27  ;;  %vm281_vm4 = vcmp.eq.f32.partialorder %v280_v42, 8.507059e+37  ;;  %27 = vst.msk [vmem:[#allocation2 + $0x8] sm:$0xff] %vm25_vm0, %v806_v40 }
  0xb1   :  { %v773_v51 = vpop.eup %772  ;;  %v270_v58 = vadd.f32 1.0, %v268_v50  ;;  %697 = vmatpush.msra.mxu3 %v897_v52  ;;  %652 = vmatpush.msra.mxu2 %v458_v37 }
  0xb2   :  { %v272_v57 = vmul.f32 %v773_v51, %v269_v36  ;;  %vm277_vm1 = vweird.f32 %v773_v51 }
  0xb3   :  { %774 = vrcp.f32 %v270_v58  ;;  %699 = vmatpush.msra.mxu3 %v917_v59  ;;  %vm278_vm3 = vmor %vm276_vm2, %vm277_vm1  ;;  %656 = vmatpush.msra.mxu2 %v464_v54  ;;  %v297_v27 = vand.u32 2147483648, %v270_v58  ;;  %v295_v38 = vand.u32 2147483647, %v270_v58  ;;  %vm291_vm6 = vweird.f32 %v270_v58 }
  0xb4   :  { %v273_v63 = vsub.f32 1.0, %v272_v57 }
  0xb5   :  { %701 = vmatpush.msra.mxu3 %v927_v0  ;;  %660 = vmatpush.msra.mxu2 %v470_v6  ;;  %v298_v56 = vor.u32 1.1754944e-38, %v297_v27  ;;  %v323_v6 = vmul.f32 1.442695, %v321_v28  ;;  %vm296_vm8 = vcmp.eq.f32.partialorder %v295_v38, 8.507059e+37 }
  0xb6   :  { %v274_v2 = vmul.f32 %v773_v51, %v273_v63 }
  0xb7   :  { %703 = vmatpush.msra.mxu3 %v945_v9  ;;  %664 = vmatpush.msra.mxu2 %v476_v25  ;;  %v320_v25 = vsub.f32 0.0, %v1126_v45  ;;  %776 = vpow2.f32 %v323_v6 }
  0xb8   :  { %v275_v46 = vadd.f32 %v773_v51, %v274_v2 }
  0xb9   :  { %v775_v52 = vpop.eup %774  ;;  %705 = vmatpush.msra.mxu3 %v953_v15  ;;  %668 = vmatpush.msra.mxu2 %v482_v31 }
  0xba   :  { %v279_v8 = vsel %vm278_vm3, %v773_v51, %v275_v46  ;;  %v287_v21 = vmul.f32 %v775_v52, %v270_v58  ;;  %vm292_vm5 = vweird.f32 %v775_v52 }
  0xbb   :  { %v284_v14 = vsel %vm281_vm4, %v283_v7, %v279_v8  ;;  %707 = vmatpush.msra.mxu3 %v973_v22  ;;  %672 = vmatpush.msra.mxu2 %v488_v49  ;;  %vm293_vm7 = vmor %vm291_vm6, %vm292_vm5 }
  0xbc   :  { %v301_v59 = vmul.f32 1.0614054, %v284_v14  ;;  %v288_v24 = vsub.f32 1.0, %v287_v21 }
  0xbd   :  { %709 = vmatpush.msra.mxu3 %v986_v29  ;;  %676 = vmatpush.msra.mxu2 %v494_v12  ;;  %v777_v4 = vpop.eup %776 }
  0xbe   :  { %v303_v0 = vadd.f32 -1.4531521, %v301_v59  ;;  %v289_v37 = vmul.f32 %v775_v52, %v288_v24 }
  0xbf   :  { %711 = vmatpush.msra.mxu3 %v1005_v43  ;;  %680 = vmatpush.msra.mxu2 %v500_v35  ;;  %v322_v43 = vmul.f32 %v320_v25, %v1126_v45 }
  0xc0   :  { %v305_v9 = vmul.f32 %v303_v0, %v284_v14  ;;  %v290_v54 = vadd.f32 %v775_v52, %v289_v37 }
  0xc1   :  { %713 = vmatpush.msra.mxu3 %v1020_v60  ;;  %v325_v60 = vmul.f32 1.442695, %v322_v43 }
  0xc2   :  { %v307_v15 = vadd.f32 1.4214138, %v305_v9  ;;  %v294_v10 = vsel %vm293_vm7, %v775_v52, %v290_v54  ;;  %v341_v54 = vld [vmem:[#allocation2] sm:$0xff] }
  0xc3   :  { %v299_v16 = vsel %vm296_vm8, %v298_v56, %v294_v10  ;;  %715 = vmatpush.msra.mxu3 %v1029_v5  ;;  %778 = vpow2.f32 %v325_v60 }
  0xc4   :  { %v309_v22 = vmul.f32 %v307_v15, %v284_v14  ;;  %v302_v31 = vmul.f32 1.0614054, %v299_v16 }
  0xc5   :  { %717 = vmatpush.msra.mxu3 %v1044_v18 }
  0xc6   :  { %v311_v29 = vadd.f32 -0.28449672, %v309_v22  ;;  %v304_v32 = vadd.f32 -1.4531521, %v302_v31 }
  0xc7   :  { %719 = vmatpush.msra.mxu3 %v1062_v33 }
  0xc8   :  { %v313_v49 = vmul.f32 %v311_v29, %v284_v14  ;;  %v306_v55 = vmul.f32 %v304_v32, %v299_v16  ;;  %v342_v29 = vld [vmem:[#allocation2 + $0x8] sm:$0xff] }
  0xc9   :  { %721 = vmatpush.msra.mxu3 %v1085_v62  ;;  %v779_v35 = vpop.eup %778 }
  0xca   :  { %v315_v61 = vadd.f32 0.2548296, %v313_v49  ;;  %v308_v1 = vadd.f32 1.4214138, %v306_v55  ;;  %v771_v49 = vld [vmem:[%s1193_s4] ss:$0 sm:$0xff] }
  0xcb   :  { %s808_s4 = smov 128  }
  0xcc   :  { %v317_v3 = vmul.f32 %v315_v61, %v284_v14  ;;  %v310_v11 = vmul.f32 %v308_v1, %v299_v16 }
  0xce   :  { %v327_v12 = vmul.f32 %v777_v4, %v317_v3  ;;  %v312_v13 = vadd.f32 -0.28449672, %v310_v11 }
  0xd0   :  { %v329_v19 = vsub.f32 1.0, %v327_v12  ;;  %v314_v5 = vmul.f32 %v312_v13, %v299_v16 }
  0xd2   :  { %v333_v20 = vsub.f32 0.0, %v329_v19  ;;  %v316_v23 = vadd.f32 0.2548296, %v314_v5 }
  0xd4   :  { %v335_v18 = vsel %vm331_vm9, %v333_v20, %v329_v19  ;;  %v318_v33 = vmul.f32 %v316_v23, %v299_v16 }
  0xd5   :  { %v337_v34 = vadd.f32 1.0, %v335_v18 }
  0xd6   :  { %v328_v41 = vmul.f32 %v779_v35, %v318_v33 }
  0xd7   :  { %v339_v36 = vmul.f32 %v337_v34, %v261_v26 }
  0xd8   :  { %v330_v53 = vsub.f32 1.0, %v328_v41 }
  0xd9   :  { %v391_v44 = vand.u32 4294901760, %v339_v36 }
  0xda   :  { %v334_v45 = vsub.f32 0.0, %v330_v53 }
  0xdb   :  { %v392_v62 = vsub.f32 %v339_v36, %v391_v44  ;;  %505 = vmatmul.f32.vlgmr.msrb.gmra.mxu3 %v391_v44 }
  0xdc   :  { %v336_v50 = vsel %vm332_vm10, %v334_v45, %v330_v53 }
  0xdd   :  { %563 = vmatmul.f32.vlgmr.msra.gmra.mxu0 %v392_v62  ;;  %v393_v51 = vand.u32 4294901760, %v392_v62  ;;  %v338_v57 = vadd.f32 1.0, %v336_v50 }
  0xdf   :  { %607 = vmatmul.f32.vlgmr.msra.gmra.mxu1 %v393_v51  ;;  %v394_v30 = vsub.f32 %v392_v62, %v393_v51  ;;  %v340_v58 = vmul.f32 %v338_v57, %v262_v47 }
  0xe1   :  { %v395_v63 = vand.u32 4294901760, %v394_v30  ;;  %v399_v39 = vand.u32 4294901760, %v340_v58 }
  0xe3   :  { %396 = vmatmul.f32.vlgmr.msrb.gmra.mxu2 %v395_v63  ;;  %509 = vmatmul.f32.gmra.mxu3 %v399_v39  ;;  %v400_v2 = vsub.f32 %v340_v58, %v399_v39 }
  0xe5   :  { %568 = vmatmul.f32.gmra.mxu0 %v400_v2  ;;  %v401_v42 = vand.u32 4294901760, %v400_v2 }
  0xe7   :  { %613 = vmatmul.f32.gmra.mxu1 %v401_v42  ;;  %v402_v46 = vsub.f32 %v400_v2, %v401_v42 }
  0xe9   :  { %v403_v7 = vand.u32 4294901760, %v402_v46 }
  0xeb   :  { %404 = vmatmul.f32.gmra.mxu2 %v403_v7  ;;  %723 = vmatmul.f32.vlgmr.msra.gmra.mxu3 %v391_v44 }
  0xf3   :  { %682 = vmatmul.f32.vlgmr.msra.gmra.mxu2 %v391_v44  ;;  %727 = vmatmul.f32.gmra.mxu3 %v399_v39 }
  0xfb   :  { %686 = vmatmul.f32.gmra.mxu2 %v399_v39 }
 0x15a   :  { %v564_v17 = vpop.f32.mrf.mxu0 }
 0x15c   :  { %v608_v24 = vpop.f32.mrf.mxu1 }
 0x15e   :  { %v506_v48 = vpop.f32.mrf.mxu3 }
 0x162   :  { %v569_v9 = vpop.f32.mrf.mxu0 }
 0x164   :  { %v614_v10 = vpop.f32.mrf.mxu1 }
 0x166   :  { %v397_v52 = vpop.f32.mrf.mxu2  ;;  %v510_v8 = vpop.f32.mrf.mxu3 }
 0x167   :  { %v507_v14 = vadd.f32 %v506_v48, %v397_v52 }
 0x169   :  { %v565_v59 = vadd.f32 %v564_v17, %v507_v14 }
 0x16b   :  { %v609_v27 = vadd.f32 %v608_v24, %v565_v59 }
 0x16e   :  { %v405_v21 = vpop.f32.mrf.mxu2  ;;  %v724_v28 = vpop.f32.mrf.mxu3 }
 0x16f   :  { %v511_v0 = vadd.f32 %v510_v8, %v405_v21 }
 0x171   :  { %v570_v15 = vadd.f32 %v569_v9, %v511_v0 }
 0x173   :  { %v615_v22 = vadd.f32 %v614_v10, %v570_v15 }
 0x176   :  { %v683_v37 = vpop.f32.mrf.mxu2  ;;  %v728_v31 = vpop.f32.mrf.mxu3 }
 0x177   :  { %v684_v38 = vadd.f32 %v683_v37, %v609_v27 }
 0x179   :  { %v725_v56 = vadd.f32 %v724_v28, %v684_v38 }
 0x17b   :  { %v731_v6 = vadd.f32 %v725_v56, %v341_v54 }
 0x17d   :  { %733 = vst.msk [vmem:[#allocation2] sm:$0xff] %vm25_vm0, %v731_v6 }
 0x17e   :  { %v687_v16 = vpop.f32.mrf.mxu2 }
 0x17f   :  { %v688_v25 = vadd.f32 %v687_v16, %v615_v22 }
 0x181   :  { %v729_v32 = vadd.f32 %v728_v31, %v688_v25 }
 0x183   :  { %v732_v43 = vadd.f32 %v729_v32, %v342_v29 }
 0x184   :  { %v738_v55 = vld [vmem:[#allocation2] sm:$0xff] }
 0x185   :  { %734 = vst.msk [vmem:[#allocation2 + $0x8] sm:$0xff] %vm25_vm0, %v732_v43  ;;  %v744_v61 = vadd.f32 %v771_v49, %v738_v55 }
 0x187   :  { %746 = vst.msk [vmem:[#allocation3] sm:$0xff] %vm25_vm0, %v744_v61 }
 0x18c   :  { %v739_v1 = vld [vmem:[#allocation2 + $0x8] sm:$0xff] }
 0x18d   :  { %v745_v3 = vadd.f32 %v771_v49, %v739_v1 }
 0x18f   :  { %747 = vst.msk [vmem:[#allocation3 + $0x8] sm:$0xff] %vm25_vm0, %v745_v3 }
 0x190   :  { %760 = dma.vmem_to_hbm [thread:$0]  %s753_s11, 256, %s755_s14, [#allocation4], %s808_s4, %s808_s4, %s809_s15  }
 0x191   :  { %804 = dma.done.wait [#allocation4], 256  }
 0x192   :  { %805 = vsyncadd [#allocation4], 4294967040 }
 0x193   :  { %765 = vsyncpa [#allocation4], 1 }

</bundles_post_ra>
